<compile_context>
chip_gen: v7x
topology: tpu7x:2x2x1
jax: 0.10.0
libtpu: 0.0.40
codegen_flags: <defaults>
</compile_context>

<pallas_src>
import jax
import jax.numpy as jnp
from jax.experimental import pallas as pl
from jax.experimental.pallas import tpu as pltpu


def _round_up(x, m):
    return ((x + m - 1) // m) * m


def _attention_kernel(z1_ref, z2_ref, w1_ref, w2_ref, b_ref, q_ref, out_ref):
    """One batch tile.

    z1_ref, z2_ref : (TB, D)  input streams, stored dtype (f32 or bf16)
    w1_ref, w2_ref : (O, D)   weights, same dtype as z (MXU operands)
    b_ref, q_ref   : (O, 1)   f32 bias / attention vector (columns)
    out_ref        : (2, TB)  f32 softmax weights, lane-dense on the batch axis
    """
    b = b_ref[...]
    q = q_ref[...]
    # Full f32 matmul passes only make sense for f32 inputs; bf16 inputs are a
    # single MXU pass with f32 accumulation either way.  (Trace-time branch.)
    prec = (jax.lax.Precision.HIGHEST
            if z1_ref.dtype == jnp.float32 else jax.lax.Precision.DEFAULT)

    def stream_logits(z_ref, w_ref):
        # (O, D) x (TB, D)^T -> (O, TB): batch stays on the lane axis, so the
        # bias add / tanh / q-multiply / O-reduction below are all lane-dense.
        h = jax.lax.dot_general(
            w_ref[...], z_ref[...],
            dimension_numbers=(((1,), (1,)), ((), ())),
            preferred_element_type=jnp.float32,
            precision=prec,
        )
        h = jnp.tanh(h + b)                               # (O, TB), f32 EUP/VPU tail
        return jnp.sum(h * q, axis=0, keepdims=True)      # (1, TB)

    o1 = stream_logits(z1_ref, w1_ref)
    o2 = stream_logits(z2_ref, w2_ref)

    # 2-way softmax across the stream axis; exact divide (denominator is only
    # a (1, TB) vector, cost is negligible and the alphas sum to 1 exactly).
    m = jnp.maximum(o1, o2)
    e1 = jnp.exp(o1 - m)
    e2 = jnp.exp(o2 - m)
    inv = 1.0 / (e1 + e2)
    out_ref[...] = jnp.concatenate([e1 * inv, e2 * inv], axis=0).astype(out_ref.dtype)


def _vmem_budget_bytes():
    """~3/4 of the chip's VMEM (v7x: 48 MiB, v5e/v6e: 96 MiB); safe fallback 48 MiB."""
    try:
        cap = int(pltpu.get_tpu_info().vmem_capacity_bytes)
    except Exception:
        cap = 64 * 1024 * 1024
    return (cap * 3) // 4


def _auto_tile_b(B, D, O, z_itemsize, budget):
    if B <= 128:
        return B                          # single full block, no tiling constraints
    d_pad = _round_up(D, 128)             # minor dim pads to 128 lanes in VMEM
    o_pad = _round_up(O, 8)               # sublane padding
    per_row = (
        2 * 2 * d_pad * z_itemsize        # z1 + z2 tiles, double-buffered
        + 2 * o_pad * 4                   # h1 + h2 f32 intermediates (O, TB)
        + 4 * o_pad * 4                   # tanh/exp temporaries (slack)
        + 2 * 2 * 4                       # (2, TB) f32 output, double-buffered
    )
    fixed = 2 * 2 * o_pad * d_pad * z_itemsize + 4 * o_pad * 128 * 4  # weights + b/q
    tile = (budget - fixed) // per_row
    tile = max(128, min(8192, (tile // 128) * 128))
    # v7x has two TensorCores: keep the "parallel" batch grid at >= 2 steps so the
    # second core is not idle (harmless extra step on v5e/v6e).
    tile = min(tile, max(128, _round_up(pl.cdiv(B, 2), 128)))
    return tile


def attention_module_forward(z1, z2, W_z1, W_z2, b, q, *, tile_b=None):
    """z1, z2: (B, D); W_z*: (O, D); b: (O,); q: (O, 1).

    Returns (alpha_z1, alpha_z2), each shape (B,), matching the PyTorch module.
    z1/z2 are streamed in their stored dtype (pass bf16 only if they are already
    stored as bf16 upstream); only the tiny (O, D) weights are cast to match.
    """
    B, D = z1.shape
    O = W_z1.shape[0]

    mxu_dtype = z1.dtype
    w1 = W_z1.astype(mxu_dtype)
    w2 = W_z2.astype(mxu_dtype)
    b2d = b.reshape(O, 1).astype(jnp.float32)
    q2d = q.reshape(O, 1).astype(jnp.float32)

    budget = _vmem_budget_bytes()
    if tile_b is None:
        tile_b = _auto_tile_b(B, D, O, jnp.dtype(mxu_dtype).itemsize, budget)
    grid = (pl.cdiv(B, tile_b),)

    out = pl.pallas_call(
        _attention_kernel,
        out_shape=jax.ShapeDtypeStruct((2, B), jnp.float32),
        grid_spec=pltpu.PrefetchScalarGridSpec(
            num_scalar_prefetch=0,
            grid=grid,
            in_specs=[
                pl.BlockSpec((tile_b, D), lambda i: (i, 0)),   # z1 batch tile
                pl.BlockSpec((tile_b, D), lambda i: (i, 0)),   # z2 batch tile
                pl.BlockSpec((O, D), lambda i: (0, 0)),        # W_z1 (resident)
                pl.BlockSpec((O, D), lambda i: (0, 0)),        # W_z2 (resident)
                pl.BlockSpec((O, 1), lambda i: (0, 0)),        # bias column
                pl.BlockSpec((O, 1), lambda i: (0, 0)),        # q column
            ],
            out_specs=pl.BlockSpec((2, tile_b), lambda i: (0, i)),  # lane-dense (2, B)
        ),
        compiler_params=pltpu.CompilerParams(
            dimension_semantics=("parallel",),
            vmem_limit_bytes=budget,
        ),
    )(z1, z2, w1, w2, b2d, q2d)

    return out[0], out[1]


def _reference(z1, z2, W_z1, W_z2, b, q):
    """Plain-JAX reference, same math as the PyTorch module (full f32 precision)."""
    hp = jax.lax.Precision.HIGHEST
    h1 = jnp.tanh(jnp.matmul(W_z1, z1.T, precision=hp) + b[:, None])
    h2 = jnp.tanh(jnp.matmul(W_z2, z2.T, precision=hp) + b[:, None])
    o1 = jnp.matmul(q.T, h1, precision=hp)[0]
    o2 = jnp.matmul(q.T, h2, precision=hp)[0]
    alphas = jax.nn.softmax(jnp.stack([o1, o2], axis=0), axis=0)
    return alphas[0], alphas[1]


if __name__ == "__main__":
    input_dim, output_dim = 32, 16

    key = jax.random.PRNGKey(0)
    kw1, kw2, kq, kz1, kz2 = jax.random.split(key, 5)

    # Deterministic parameter init (matches torch.randn / zeros shapes).
    W_z1 = jax.random.normal(kw1, (output_dim, input_dim), dtype=jnp.float32)
    W_z2 = jax.random.normal(kw2, (output_dim, input_dim), dtype=jnp.float32)
    b = jnp.zeros((output_dim,), dtype=jnp.float32)
    q = jax.random.normal(kq, (output_dim, 1), dtype=jnp.float32)

    # --- small demo batch (single full block) -------------------------------------
    batch = 8
    z1 = jax.random.normal(kz1, (batch, input_dim), dtype=jnp.float32)
    z2 = jax.random.normal(kz2, (batch, input_dim), dtype=jnp.float32)

    ref1, ref2 = _reference(z1, z2, W_z1, W_z2, b, q)
    alpha_z1, alpha_z2 = attention_module_forward(z1, z2, W_z1, W_z2, b, q)
    jax.block_until_ready((alpha_z1, alpha_z2))
    assert alpha_z1.shape == (batch,) and alpha_z2.shape == (batch,)
    assert jnp.allclose(alpha_z1, ref1, atol=2e-3), float(jnp.max(jnp.abs(alpha_z1 - ref1)))
    assert jnp.allclose(alpha_z2, ref2, atol=2e-3), float(jnp.max(jnp.abs(alpha_z2 - ref2)))
    assert jnp.allclose(alpha_z1 + alpha_z2, jnp.ones_like(alpha_z1), atol=1e-4)

    # --- batch-tiled path: multi-step "parallel" grid, evenly divisible -----------
    bt = 384
    zz1 = jax.random.normal(jax.random.PRNGKey(1), (bt, input_dim), dtype=jnp.float32)
    zz2 = jax.random.normal(jax.random.PRNGKey(2), (bt, input_dim), dtype=jnp.float32)
    r1, r2 = _reference(zz1, zz2, W_z1, W_z2, b, q)
    t1, t2 = attention_module_forward(zz1, zz2, W_z1, W_z2, b, q, tile_b=128)
    jax.block_until_ready((t1, t2))
    assert jnp.allclose(t1, r1, atol=2e-3) and jnp.allclose(t2, r2, atol=2e-3)

    # --- ragged final tile: partial blocks, no input padding ----------------------
    br = 200
    zr1 = jax.random.normal(jax.random.PRNGKey(3), (br, input_dim), dtype=jnp.float32)
    zr2 = jax.random.normal(jax.random.PRNGKey(4), (br, input_dim), dtype=jnp.float32)
    rr1, rr2 = _reference(zr1, zr2, W_z1, W_z2, b, q)
    g1, g2 = attention_module_forward(zr1, zr2, W_z1, W_z2, b, q, tile_b=128)
    jax.block_until_ready((g1, g2))
    assert jnp.allclose(g1, rr1, atol=2e-3) and jnp.allclose(g2, rr2, atol=2e-3)

    # --- bf16 activation path (only when z is already stored in bf16 upstream) ----
    a1_bf, a2_bf = attention_module_forward(
        z1.astype(jnp.bfloat16), z2.astype(jnp.bfloat16), W_z1, W_z2, b, q)
    jax.block_until_ready((a1_bf, a2_bf))
    assert jnp.allclose(a1_bf, ref1, atol=1e-1) and jnp.allclose(a2_bf, ref2, atol=1e-1)

    print("KERNEL_OK")
</pallas_src>

<mosaic_0001>
module attributes {stable_mosaic.version = 11 : i64} {
  func.func @_attention_kernel(%arg0: i32, %arg1: memref<8x32xf32, #tpu.memory_space<vmem>>, %arg2: memref<8x32xf32, #tpu.memory_space<vmem>>, %arg3: memref<16x32xf32, #tpu.memory_space<vmem>>, %arg4: memref<16x32xf32, #tpu.memory_space<vmem>>, %arg5: memref<16x1xf32, #tpu.memory_space<vmem>>, %arg6: memref<16x1xf32, #tpu.memory_space<vmem>>, %arg7: memref<2x8xf32, #tpu.memory_space<vmem>>) attributes {dimension_semantics = [#tpu.dimension_semantics<parallel>], iteration_bounds = array<i64: 1>, scalar_prefetch = 0 : i64, scratch_operands = 0 : i64, tpu.core_type = #tpu.core_type<tc>, window_params = [{transform_indices = @transform_0, window_bounds = array<i64: 8, 32>}, {transform_indices = @transform_1, window_bounds = array<i64: 8, 32>}, {pipeline_mode = #tpu.pipeline_mode<synchronous>, transform_indices = @transform_2, window_bounds = array<i64: 16, 32>}, {pipeline_mode = #tpu.pipeline_mode<synchronous>, transform_indices = @transform_3, window_bounds = array<i64: 16, 32>}, {pipeline_mode = #tpu.pipeline_mode<synchronous>, transform_indices = @transform_4, window_bounds = array<i64: 16, 1>}, {pipeline_mode = #tpu.pipeline_mode<synchronous>, transform_indices = @transform_5, window_bounds = array<i64: 16, 1>}, {transform_indices = @transform_6, window_bounds = array<i64: 2, 8>}]} {
    %c0 = arith.constant 0 : index
    %c0_0 = arith.constant 0 : index
    %0 = vector.load %arg5[%c0, %c0_0] : memref<16x1xf32, #tpu.memory_space<vmem>>, vector<16x1xf32>
    %c0_1 = arith.constant 0 : index
    %c0_2 = arith.constant 0 : index
    %1 = vector.load %arg6[%c0_1, %c0_2] : memref<16x1xf32, #tpu.memory_space<vmem>>, vector<16x1xf32>
    %c0_3 = arith.constant 0 : index
    %c0_4 = arith.constant 0 : index
    %2 = vector.load %arg3[%c0_3, %c0_4] : memref<16x32xf32, #tpu.memory_space<vmem>>, vector<16x32xf32>
    %c0_5 = arith.constant 0 : index
    %c0_6 = arith.constant 0 : index
    %3 = vector.load %arg1[%c0_5, %c0_6] : memref<8x32xf32, #tpu.memory_space<vmem>>, vector<8x32xf32>
    %cst = arith.constant dense<0.000000e+00> : vector<16x8xf32>
    %4 = tpu.matmul %2, %3, %cst {dimension_numbers = #tpu.dot_dimension_numbers<[1], [1], [0], [0], [0, 0, 1, 0], [], []>, precision = #tpu.contract_precision<fp32>} : vector<16x32xf32>, vector<8x32xf32>, vector<16x8xf32> -> vector<16x8xf32>
    %5 = vector.broadcast %0 : vector<16x1xf32> to vector<16x8xf32>
    %6 = arith.addf %4, %5 : vector<16x8xf32>
    %7 = math.tanh %6 : vector<16x8xf32>
    %8 = vector.broadcast %1 : vector<16x1xf32> to vector<16x8xf32>
    %9 = arith.mulf %7, %8 : vector<16x8xf32>
    %cst_7 = arith.constant dense<0.000000e+00> : vector<8xf32>
    %10 = vector.multi_reduction <add>, %9, %cst_7 [0] : vector<16x8xf32> to vector<8xf32>
    %11 = vector.shape_cast %10 : vector<8xf32> to vector<1x8xf32>
    %c0_8 = arith.constant 0 : index
    %c0_9 = arith.constant 0 : index
    %12 = vector.load %arg4[%c0_8, %c0_9] : memref<16x32xf32, #tpu.memory_space<vmem>>, vector<16x32xf32>
    %c0_10 = arith.constant 0 : index
    %c0_11 = arith.constant 0 : index
    %13 = vector.load %arg2[%c0_10, %c0_11] : memref<8x32xf32, #tpu.memory_space<vmem>>, vector<8x32xf32>
    %cst_12 = arith.constant dense<0.000000e+00> : vector<16x8xf32>
    %14 = tpu.matmul %12, %13, %cst_12 {dimension_numbers = #tpu.dot_dimension_numbers<[1], [1], [0], [0], [0, 0, 1, 0], [], []>, precision = #tpu.contract_precision<fp32>} : vector<16x32xf32>, vector<8x32xf32>, vector<16x8xf32> -> vector<16x8xf32>
    %15 = vector.broadcast %0 : vector<16x1xf32> to vector<16x8xf32>
    %16 = arith.addf %14, %15 : vector<16x8xf32>
    %17 = math.tanh %16 : vector<16x8xf32>
    %18 = vector.broadcast %1 : vector<16x1xf32> to vector<16x8xf32>
    %19 = arith.mulf %17, %18 : vector<16x8xf32>
    %cst_13 = arith.constant dense<0.000000e+00> : vector<8xf32>
    %20 = vector.multi_reduction <add>, %19, %cst_13 [0] : vector<16x8xf32> to vector<8xf32>
    %21 = vector.shape_cast %20 : vector<8xf32> to vector<1x8xf32>
    %22 = arith.maximumf %11, %21 : vector<1x8xf32>
    %23 = arith.subf %11, %22 : vector<1x8xf32>
    %24 = math.exp %23 : vector<1x8xf32>
    %25 = arith.subf %21, %22 : vector<1x8xf32>
    %26 = math.exp %25 : vector<1x8xf32>
    %27 = arith.addf %24, %26 : vector<1x8xf32>
    %cst_14 = arith.constant 1.000000e+00 : f32
    %28 = vector.broadcast %cst_14 : f32 to vector<1x8xf32>
    %29 = arith.divf %28, %27 : vector<1x8xf32>
    %30 = arith.mulf %24, %29 : vector<1x8xf32>
    %31 = arith.mulf %26, %29 : vector<1x8xf32>
    %32 = tpu.concatenate %30, %31 in 0 : vector<1x8xf32>, vector<1x8xf32> -> vector<2x8xf32>
    %c0_15 = arith.constant 0 : index
    %c0_16 = arith.constant 0 : index
    %33 = vector.load %arg7[%c0_15, %c0_16] : memref<2x8xf32, #tpu.memory_space<vmem>>, vector<2x8xf32>
    tpu.vector_store %arg7[%c0_15, %c0_16], %32 {strides = array<i32>} : memref<2x8xf32, #tpu.memory_space<vmem>>, vector<2x8xf32>,
    return
  }
  func.func @transform_0(%arg0: i32) -> (i32, i32) {
    %c0_i32 = arith.constant 0 : i32
    %c0_i32_0 = arith.constant 0 : i32
    return %arg0, %c0_i32 : i32, i32
  }
  func.func @transform_1(%arg0: i32) -> (i32, i32) {
    %c0_i32 = arith.constant 0 : i32
    %c0_i32_0 = arith.constant 0 : i32
    return %arg0, %c0_i32 : i32, i32
  }
  func.func @transform_2(%arg0: i32) -> (i32, i32) {
    %c0_i32 = arith.constant 0 : i32
    %c0_i32_0 = arith.constant 0 : i32
    %c0_i32_1 = arith.constant 0 : i32
    return %c0_i32, %c0_i32_0 : i32, i32
  }
  func.func @transform_3(%arg0: i32) -> (i32, i32) {
    %c0_i32 = arith.constant 0 : i32
    %c0_i32_0 = arith.constant 0 : i32
    %c0_i32_1 = arith.constant 0 : i32
    return %c0_i32, %c0_i32_0 : i32, i32
  }
  func.func @transform_4(%arg0: i32) -> (i32, i32) {
    %c0_i32 = arith.constant 0 : i32
    %c0_i32_0 = arith.constant 0 : i32
    %c0_i32_1 = arith.constant 0 : i32
    return %c0_i32, %c0_i32_0 : i32, i32
  }
  func.func @transform_5(%arg0: i32) -> (i32, i32) {
    %c0_i32 = arith.constant 0 : i32
    %c0_i32_0 = arith.constant 0 : i32
    %c0_i32_1 = arith.constant 0 : i32
    return %c0_i32, %c0_i32_0 : i32, i32
  }
  func.func @transform_6(%arg0: i32) -> (i32, i32) {
    %c0_i32 = arith.constant 0 : i32
    %c0_i32_0 = arith.constant 0 : i32
    return %c0_i32, %arg0 : i32, i32
  }
}

</mosaic_0001>

<bundles_post_ra>
// kernel: tpu_custom_call.1
= control target key start
LH: loop header
LB: loop body
LE: loop exit
PB: predicated region body
PF: predicated region fallthrough
CT: control target
= control target key end

     0   :  { %11 = vsyncpa [#allocation3], 0  ;;  %s1493_s0 = inlined_call_operand.hbm [shape: f32[8,32], index: 0, kind: input, shape index: {}]   ;;  %s1494_s1 = inlined_call_operand.hbm [shape: f32[8,32], index: 1, kind: input, shape index: {}]   ;;  %s1495_s2 = inlined_call_operand.vmem [shape: f32[16,32], index: 2, kind: input, shape index: {}]   ;;  %s1496_s3 = inlined_call_operand.vmem [shape: f32[16,32], index: 3, kind: input, shape index: {}]   ;;  %s1497_s4 = inlined_call_operand.vmem [shape: f32[16,1], index: 4, kind: input, shape index: {}]   ;;  %s1498_s5 = inlined_call_operand.vmem [shape: f32[16,1], index: 5, kind: input, shape index: {}]   ;;  %s1499_s6 = inlined_call_operand.hbm [shape: f32[2,8], index: 6, kind: output, shape index: {}]  }
   0x1   :  { %12 = vsyncpa [#allocation6], 0 }
   0x2   :  { %13 = vsyncpa [#allocation4], 0  ;;  %s1346_s21 = smov [#allocation2]   ;;  %s1347_s23 = smov [#allocation5]  }
   0x3   :  { %s20_s22 = sshll.u32 %s1346_s21, 4  ;;  %s30_s24 = sshll.u32 %s1347_s23, 4  ;;  %s21_s22 = int_to_ptr.vmem [resolvable:$true] %s20_s22  ;;  %s31_s24 = int_to_ptr.vmem [resolvable:$true] %s30_s24 }
   0x4   :  { %s1274_s27 = scalar_lea.hbm %s1493_s0, 128 }
   0x5   :  { %p1275_p0 = scmp.ne.s32.totalorder %s1493_s0, %s1274_s27  ;;  %p1278_p1 = scmp.lt.u32.totalorder %s1274_s27, %s1493_s0 }
   0x7   :  { %p1280_p2 = pnand %p1278_p1, %p1275_p0 }
   0x9   :  { %1283 = shalt.err (!%p1280_p2)
}
   0xa   :  { %s1284_s8 = scalar_lea.vmem %s21_s22, 128  ;;  %p1289_p4 = scmp.lt.s32.totalorder %s21_s22, %s21_s22 }
   0xb   :  { %p1285_p3 = scmp.ne.s32.totalorder %s21_s22, %s1284_s8  ;;  %p1290_p5 = scmp.lt.s32.totalorder %s1284_s8, %s1284_s8 }
   0xd   :  { %p1291_p6 = por %p1290_p5, %p1289_p4 }
   0xf   :  { %p1292_p7 = pnand %p1291_p6, %p1285_p3 }
  0x11   :  { %1295 = shalt.err (!%p1292_p7)
}
  0x12   :  { %23 = dma.hbm_to_vmem [thread:$0]  %s1493_s0, 128, %s21_s22, [#allocation3]  }
  0x13   :  { %s1296_s13 = scalar_lea.hbm %s1494_s1, 128 }
  0x14   :  { %p1297_p8 = scmp.ne.s32.totalorder %s1494_s1, %s1296_s13  ;;  %p1300_p9 = scmp.lt.u32.totalorder %s1296_s13, %s1494_s1 }
  0x16   :  { %p1302_p10 = pnand %p1300_p9, %p1297_p8 }
  0x18   :  { %1305 = shalt.err (!%p1302_p10)
}
  0x19   :  { %s1306_s18 = scalar_lea.vmem %s31_s24, 128  ;;  %p1311_p12 = scmp.lt.s32.totalorder %s31_s24, %s31_s24 }
  0x1a   :  { %p1307_p11 = scmp.ne.s32.totalorder %s31_s24, %s1306_s18  ;;  %p1312_p13 = scmp.lt.s32.totalorder %s1306_s18, %s1306_s18 }
  0x1c   :  { %p1313_p0 = por %p1312_p13, %p1311_p12 }
  0x1e   :  { %p1314_p1 = pnand %p1313_p0, %p1307_p11 }
  0x20   :  { %1317 = shalt.err (!%p1314_p1)
}
  0x21   :  { %33 = dma.hbm_to_vmem [thread:$0]  %s1494_s1, 128, %s31_s24, [#allocation6]  }
  0x22   :  { %1340 = dma.done.wait [#allocation3], 128  }
  0x23   :  { %1341 = vsyncadd [#allocation3], 4294967168 }
  0x24   :  { %1342 = dma.done.wait [#allocation6], 128  }
  0x25   :  { %1343 = vsyncadd [#allocation6], 4294967168  ;;  %v1348_v0 = vmov 0   ;;  %vm65_vm0 = vcmask 261120   ;;  %v54_v1 = vld [vmem:[#allocation2] sm:$0xff]  ;;  %v590_v2 = vld [vmem:[#allocation5] sm:$0xff] }
  0x26   :  { %1258 = vset.pattern.permute.xlu0 %v1348_v0  ;;  %1259 = vset.pattern.permute.xlu1 %v1348_v0  ;;  %v52_v3 = vld [vmem:[%s1495_s2] sm:$0xff]  ;;  %v73_v4 = vsel %vm65_vm0, %v54_v1, 0  ;;  %v598_v5 = vsel %vm65_vm0, %v590_v2, 0  ;;  %v53_v8 = vld [vmem:[%s1495_s2 + $0x8] sm:$0xff]  ;;  %vm578_vm1 = vcmask 64512   ;;  %vm1114_vm2 = vcmask 1040384  }
  0x27   :  { %v67_v6 = vsel %vm65_vm0, %v52_v3, 0  ;;  %v588_v7 = vld [vmem:[%s1496_s3] sm:$0xff]  ;;  %v589_v9 = vld [vmem:[%s1496_s3 + $0x8] sm:$0xff]  ;;  %v1424_v10 = vand.u32 4294901760, %v73_v4  ;;  %v1426_v11 = vand.u32 4294901760, %v598_v5  ;;  %v70_v16 = vsel %vm65_vm0, %v53_v8, 0 }
  0x28   :  { %v1428_v12 = vand.u32 4294901760, %v67_v6  ;;  %v592_v13 = vsel %vm65_vm0, %v588_v7, 0  ;;  %v48_v14 = vld [vmem:[%s1497_s4] sm:$0xff]  ;;  %v595_v17 = vsel %vm65_vm0, %v589_v9, 0  ;;  %v1446_v22 = vand.u32 4294901760, %v70_v16  ;;  %v49_v23 = vld [vmem:[%s1497_s4 + $0x8] sm:$0xff] }
  0x29   :  { %v1434_v15 = vand.u32 4294901760, %v592_v13  ;;  %57 = vperm.xlu0 %1258, %v48_v14   ;;  %v50_v18 = vld [vmem:[%s1498_s5] sm:$0xff]  ;;  %1170 = vmatprep.subr.mxu0 %v1424_v10  ;;  %v163_v20 = vsub.f32 %v73_v4, %v1424_v10  ;;  %v688_v21 = vsub.f32 %v598_v5, %v1426_v11  ;;  %v1454_v25 = vand.u32 4294901760, %v595_v17  ;;  %v51_v32 = vld [vmem:[%s1498_s5 + $0x8] sm:$0xff]  ;;  %s1349_s5 = smov [#allocation7]  }
  0x2a   :  { %1200 = vmatprep.subr.mxu1 %v1426_v11  ;;  %v142_v19 = vsub.f32 %v67_v6, %v1428_v12  ;;  %1171 = vmatpush3.xpose.msra.mxu0 %v1424_v10  ;;  %v152_v29 = vsub.f32 %v70_v16, %v1446_v22  ;;  %s1124_s8 = sshll.u32 %s1349_s5, 4  ;;  %vm1116_vm3 = vcmask 58368   ;;  %s1125_s8 = int_to_ptr.vmem [resolvable:$true] %s1124_s8 }
  0x2b   :  { %1201 = vmatpush3.xpose.msra.mxu1 %v1426_v11  ;;  %v667_v24 = vsub.f32 %v592_v13, %v1434_v15  ;;  %v164_v27 = vand.u32 4294901760, %v163_v20  ;;  %v689_v28 = vand.u32 4294901760, %v688_v21  ;;  %568 = vperm.xlu1 %1259, %v50_v18   ;;  %v677_v31 = vsub.f32 %v595_v17, %v1454_v25  ;;  %s1318_s9 = scalar_lea.vmem %s1125_s8, 32  ;;  %p1323_p3 = scmp.lt.s32.totalorder %s1125_s8, %s1125_s8 }
  0x2c   :  { %v143_v26 = vand.u32 4294901760, %v142_v19  ;;  %v153_v36 = vand.u32 4294901760, %v152_v29  ;;  %p1319_p2 = scmp.ne.s32.totalorder %s1125_s8, %s1318_s9  ;;  %p1324_p4 = scmp.lt.s32.totalorder %s1318_s9, %s1318_s9 }
  0x2d   :  { %v668_v30 = vand.u32 4294901760, %v667_v24  ;;  %62 = vperm.xlu0 %1258, %v49_v23   ;;  %v165_v34 = vsub.f32 %v163_v20, %v164_v27  ;;  %v690_v35 = vsub.f32 %v688_v21, %v689_v28  ;;  %v678_v38 = vand.u32 4294901760, %v677_v31 }
  0x2e   :  { %v144_v33 = vsub.f32 %v142_v19, %v143_v26  ;;  %v154_v42 = vsub.f32 %v152_v29, %v153_v36  ;;  %p1325_p5 = por %p1324_p4, %p1323_p3 }
  0x2f   :  { %v669_v37 = vsub.f32 %v667_v24, %v668_v30  ;;  %v166_v40 = vand.u32 4294901760, %v165_v34  ;;  %v691_v41 = vand.u32 4294901760, %v690_v35  ;;  %573 = vperm.xlu1 %1259, %v51_v32   ;;  %v679_v44 = vsub.f32 %v677_v31, %v678_v38 }
  0x30   :  { %v145_v39 = vand.u32 4294901760, %v144_v33  ;;  %v155_v45 = vand.u32 4294901760, %v154_v42  ;;  %p1326_p6 = pnand %p1325_p5, %p1319_p2 }
  0x31   :  { %v670_v43 = vand.u32 4294901760, %v669_v37  ;;  %1175 = vmatprep.subr.mxu0 %v166_v40  ;;  %1205 = vmatprep.subr.mxu1 %v691_v41  ;;  %v680_v46 = vand.u32 4294901760, %v679_v44 }
  0x32   :  { %1172 = vmatprep.mubr.f32.mxu0 %v145_v39 }
  0x33   :  { %1202 = vmatprep.mubr.f32.mxu1 %v670_v43  ;;  %1173 = vmatmul.mubr.f32.vlgmr.msra.gmra.mrb[0].mxu0 %v155_v45 }
  0x34   :  { %1176 = vmatpush3.xpose.msra.mxu0 %v166_v40  ;;  %1203 = vmatmul.mubr.f32.vlgmr.msra.gmra.mrb[0].mxu1 %v680_v46 }
  0x35   :  { %1206 = vmatpush3.xpose.msra.mxu1 %v691_v41  ;;  %1177 = vmatprep.mubr.f32.mxu0 %v1428_v12 }
  0x36   :  { %1180 = vmatprep.subr.mxu0 %v163_v20  ;;  %1207 = vmatprep.mubr.f32.mxu1 %v1434_v15 }
  0x37   :  { %1210 = vmatprep.subr.mxu1 %v688_v21 }
  0x3b   :  { %1178 = vmatmul.mubr.f32.vlgmr.msra.gmra.mrb[0].mxu0 %v1446_v22 }
  0x3c   :  { %1181 = vmatpush3.xpose.msra.mxu0 %v163_v20  ;;  %1208 = vmatmul.mubr.f32.vlgmr.msra.gmra.mrb[0].mxu1 %v1454_v25 }
  0x3d   :  { %1211 = vmatpush3.xpose.msra.mxu1 %v688_v21  ;;  %1182 = vmatprep.mubr.f32.mxu0 %v142_v19 }
  0x3e   :  { %1185 = vmatprep.subr.mxu0 %v1424_v10  ;;  %1212 = vmatprep.mubr.f32.mxu1 %v667_v24 }
  0x3f   :  { %1215 = vmatprep.subr.mxu1 %v1426_v11 }
  0x43   :  { %1183 = vmatmul.mubr.f32.vlgmr.msra.gmra.mrb[0].mxu0 %v152_v29 }
  0x44   :  { %1186 = vmatpush3.xpose.msra.mxu0 %v1424_v10  ;;  %1213 = vmatmul.mubr.f32.vlgmr.msra.gmra.mrb[0].mxu1 %v677_v31 }
  0x45   :  { %1216 = vmatpush3.xpose.msra.mxu1 %v1426_v11  ;;  %1187 = vmatprep.mubr.f32.mxu0 %v143_v26 }
  0x46   :  { %1190 = vmatprep.subr.mxu0 %v164_v27  ;;  %1217 = vmatprep.mubr.f32.mxu1 %v668_v30 }
  0x47   :  { %1220 = vmatprep.subr.mxu1 %v689_v28 }
  0x4b   :  { %1188 = vmatmul.mubr.f32.vlgmr.msra.gmra.mrb[0].mxu0 %v153_v36 }
  0x4c   :  { %1191 = vmatpush3.xpose.msra.mxu0 %v164_v27  ;;  %1218 = vmatmul.mubr.f32.vlgmr.msra.gmra.mrb[0].mxu1 %v678_v38 }
  0x4d   :  { %1221 = vmatpush3.xpose.msra.mxu1 %v689_v28  ;;  %1192 = vmatprep.mubr.f32.mxu0 %v1428_v12 }
  0x4e   :  { %1195 = vmatprep.subr.mxu0 %v1424_v10  ;;  %1222 = vmatprep.mubr.f32.mxu1 %v1434_v15 }
  0x4f   :  { %1225 = vmatprep.subr.mxu1 %v1426_v11 }
  0x53   :  { %1193 = vmatmul.mubr.f32.vlgmr.msra.gmra.mrb[0].mxu0 %v1446_v22 }
  0x54   :  { %1196 = vmatpush3.xpose.msra.mxu0 %v1424_v10  ;;  %1223 = vmatmul.mubr.f32.vlgmr.msra.gmra.mrb[0].mxu1 %v1454_v25 }
  0x55   :  { %1226 = vmatpush3.xpose.msra.mxu1 %v1426_v11  ;;  %1197 = vmatprep.mubr.f32.mxu0 %v1428_v12 }
  0x56   :  { %1227 = vmatprep.mubr.f32.mxu1 %v1434_v15 }
  0x5b   :  { %1198 = vmatmul.mubr.f32.vlgmr.msra.gmra.mrb[0].mxu0 %v1446_v22 }
  0x5c   :  { %1228 = vmatmul.mubr.f32.vlgmr.msra.gmra.mrb[0].mxu1 %v1454_v25 }
  0xa8   :  { %v58_v47 = vpop.permute.xlu0 %57 }
  0xaa   :  { %v569_v57 = vpop.permute.xlu1 %568 }
  0xac   :  { %v63_v48 = vpop.permute.xlu0 %62 }
  0xae   :  { %v574_v59 = vpop.permute.xlu1 %573 }
 0x12e   :  { %v1199_v49 = vpop.f32.mrb[0].mxu0 }
 0x12f   :  { %v1230_v50 = vadd.f32 %v1199_v49, %v63_v48  ;;  %v1229_v51 = vpop.f32.mrb[0].mxu1  ;;  %v554_v52 = vpop.f32.mrb[1].mxu0 }
 0x130   :  { %v1232_v53 = vadd.f32 %v1229_v51, %v63_v48  ;;  %v1231_v54 = vadd.f32 %v554_v52, %v58_v47  ;;  %v1079_v55 = vpop.f32.mrb[1].mxu1 }
 0x131   :  { %1260 = vtanh.f32 %v1230_v50  ;;  %v1233_v56 = vadd.f32 %v1079_v55, %v58_v47 }
 0x132   :  { %1262 = vtanh.f32 %v1232_v53 }
 0x133   :  { %1264 = vtanh.f32 %v1231_v54 }
 0x134   :  { %1266 = vtanh.f32 %v1233_v56 }
 0x13b   :  { %v1261_v58 = vpop.eup %1260 }
 0x13c   :  { %v1263_v60 = vpop.eup %1262  ;;  %v577_v61 = vmul.f32 %v1261_v58, %v574_v59 }
 0x13d   :  { %v1265_v62 = vpop.eup %1264  ;;  %v1092_v63 = vmul.f32 %v1263_v60, %v574_v59 }
 0x13e   :  { %v1267_v0 = vpop.eup %1266  ;;  %v576_v1 = vmul.f32 %v1265_v62, %v569_v57  ;;  %v580_v2 = vsel %vm578_vm1, %v577_v61, 0.0 }
 0x13f   :  { %v1091_v3 = vmul.f32 %v1267_v0, %v569_v57  ;;  %v1094_v4 = vsel %vm578_vm1, %v1092_v63, 0.0 }
 0x140   :  { %v579_v5 = vsel %vm578_vm1, %v576_v1, 0.0 }
 0x141   :  { %v1093_v6 = vsel %vm578_vm1, %v1091_v3, 0.0  ;;  %v581_v7 = vadd.f32 %v580_v2, %v579_v5 }
 0x142   :  { %v1095_v8 = vadd.f32 %v1094_v4, %v1093_v6 }
 0x143   :  { %v582_v9 = vrot.slane %v581_v7, 4 }
 0x144   :  { %v1096_v10 = vrot.slane %v1095_v8, 4 }
 0x145   :  { %v583_v11 = vadd.f32 %v582_v9, %v581_v7 }
 0x146   :  { %v1097_v12 = vadd.f32 %v1096_v10, %v1095_v8 }
 0x147   :  { %v584_v13 = vrot.slane %v583_v11, 2 }
 0x148   :  { %v1098_v14 = vrot.slane %v1097_v12, 2 }
 0x149   :  { %v585_v15 = vadd.f32 %v584_v13, %v583_v11 }
 0x14a   :  { %v1099_v16 = vadd.f32 %v1098_v14, %v1097_v12 }
 0x14b   :  { %v586_v17 = vrot.slane %v585_v15, 1 }
 0x14c   :  { %v1100_v18 = vrot.slane %v1099_v16, 1 }
 0x14d   :  { %v587_v19 = vadd.f32 %v586_v17, %v585_v15 }
 0x14e   :  { %v1101_v20 = vadd.f32 %v1100_v18, %v1099_v16 }
 0x150   :  { %v1102_v21 = vmax.f32 %v587_v19, %v1101_v20 }
 0x152   :  { %v1103_v22 = vsub.f32 %v587_v19, %v1102_v21  ;;  %v1106_v23 = vsub.f32 %v1101_v20, %v1102_v21 }
 0x154   :  { %v1104_v24 = vmul.f32 1.442695, %v1103_v22  ;;  %v1107_v25 = vmul.f32 1.442695, %v1106_v23 }
 0x156   :  { %1268 = vpow2.f32 %v1104_v24 }
 0x157   :  { %1270 = vpow2.f32 %v1107_v25 }
 0x160   :  { %v1269_v26 = vpop.eup %1268 }
 0x161   :  { %v1271_v27 = vpop.eup %1270 }
 0x162   :  { %v1109_v28 = vadd.f32 %v1271_v27, %v1269_v26 }
 0x164   :  { %1272 = vrcp.f32 %v1109_v28 }
 0x16e   :  { %v1273_v29 = vpop.eup %1272 }
 0x16f   :  { %v1112_v30 = vmul.f32 %v1273_v29, %v1269_v26  ;;  %v1113_v31 = vmul.f32 %v1273_v29, %v1271_v27 }
 0x171   :  { %v1115_v32 = vsel %vm1114_vm2, %v1112_v30, %v1113_v31 }
 0x172   :  { %1117 = vst.msk [vmem:[#allocation7] sm:$0x3] %vm1116_vm3, %v1115_v32 }
 0x173   :  { %1329 = shalt.err (!%p1326_p6)
}
 0x174   :  { %s1330_s12 = scalar_lea.hbm %s1499_s6, 32 }
 0x175   :  { %p1331_p7 = scmp.ne.s32.totalorder %s1499_s6, %s1330_s12  ;;  %p1334_p8 = scmp.lt.u32.totalorder %s1330_s12, %s1499_s6 }
 0x177   :  { %p1336_p9 = pnand %p1334_p8, %p1331_p7 }
 0x179   :  { %1339 = shalt.err (!%p1336_p9)
}
 0x17a   :  { %1127 = dma.vmem_to_hbm [thread:$0]  %s1125_s8, 32, %s1499_s6, [#allocation4]  }
 0x17b   :  { %1344 = dma.done.wait [#allocation4], 32  }
 0x17c   :  { %1345 = vsyncadd [#allocation4], 4294967264 }
 0x17d   :  { %1131 = vsyncpa [#allocation3], 1 }
 0x17e   :  { %1132 = vsyncpa [#allocation6], 1 }
 0x17f   :  { %1133 = vsyncpa [#allocation4], 1 }

</bundles_post_ra>
